<compile_context>
chip_gen: v5e
topology: v5e:2x2
jax: 0.10.0
libtpu: 0.0.40
codegen_flags: <defaults>
</compile_context>

<pallas_src>
import functools

import jax
import jax.numpy as jnp
from jax.experimental import pallas as pl
from jax.experimental.pallas import tpu as pltpu


def _focal_loss_kernel(*refs, alpha, gamma_int, gamma_f, rows_total, tile_rows,
                       use_pos_ratio, hard_targets, needs_mask):
    if use_pos_ratio:
        x_ref, t_ref, r_ref, out_ref = refs
    else:
        x_ref, t_ref, out_ref = refs
        r_ref = None

    x = x_ref[...].astype(jnp.float32)          # logits  (TB, C)
    t = t_ref[...].astype(jnp.float32)          # targets (TB, C)

    # Numerically stable BCE-with-logits (matches F.binary_cross_entropy_with_logits):
    #   loss = max(x, 0) - x*t + log(1 + exp(-|x|))
    bce = jnp.maximum(x, 0.0) - x * t + jnp.log1p(jnp.exp(-jnp.abs(x)))

    pt = jnp.exp(-bce)
    one_m_pt = 1.0 - pt
    if gamma_int is not None:
        mod = one_m_pt ** gamma_int             # integer_pow -> VPU multiplies
    else:
        mod = one_m_pt ** jnp.float32(gamma_f)  # true float gamma -> pow
    loss = mod * bce
    if alpha != 1.0:
        loss = loss * jnp.float32(alpha)

    if use_pos_ratio:
        if hard_targets:
            # exp() hoisted to the wrapper: r_ref holds [exp(r); exp(1-r)], (2, C).
            exp_r = r_ref[0:1, :]
            exp_1mr = r_ref[1:2, :]
            weight = t * exp_1mr + (1.0 - t) * exp_r        # exact for t in {0,1}
        else:
            r = r_ref[0:1, :]                               # (1, C)
            weight = jnp.exp(t * (1.0 - r) + (1.0 - t) * r)
        loss = loss * weight

    if needs_mask:
        # Last block may extend past B; zero the out-of-range rows before reducing.
        row = jax.lax.broadcasted_iota(jnp.int32, loss.shape, 0)
        valid = (pl.program_id(0) * tile_rows + row) < rows_total
        loss = jnp.where(valid, loss, 0.0)

    # Per-block partial column sums, written to this block's private output slot.
    colsum = jnp.sum(loss, axis=0, keepdims=True)           # (1, C)
    rows8 = jax.lax.broadcasted_iota(jnp.int32, (8, colsum.shape[1]), 0)
    out_ref[...] = jnp.where(rows8 == 0, colsum, 0.0)[None, :, :]


def _vmem_capacity_bytes():
    try:
        return int(pltpu.get_tpu_info().vmem_capacity_bytes)
    except Exception:
        return None


def _default_tile_rows(B, C, in_itemsize, tgt_itemsize, vmem_cap):
    cap = vmem_cap if vmem_cap is not None else 64 * 1024 * 1024
    # Double-buffered inputs + ~4 f32 temporaries per tile row, keep to ~1/3 of VMEM.
    per_row = 2 * C * (in_itemsize + tgt_itemsize) + 4 * C * 4
    tb = (cap // 3) // max(per_row, 1)
    tb = int(max(8, min(tb, 2048)))
    return (tb // 8) * 8


def focal_loss(inputs, targets, pos_ratio=None, alpha=1.0, gamma=2,
               reduction="mean", hard_targets=False, tile_rows=None):
    """inputs, targets: (B, C) float arrays (f32 or bf16). pos_ratio: (C,) or None.

    hard_targets=True enables the hoisted-exp pos_ratio weight (exact only for
    targets in {0, 1}); leave False for soft targets.
    """
    assert reduction in ("sum", "mean"), "reduction must be mean or sum"
    B, C = inputs.shape
    use_pos_ratio = pos_ratio is not None

    gamma_f = float(gamma)
    gamma_int = int(gamma_f) if gamma_f.is_integer() else None

    vmem_cap = _vmem_capacity_bytes()
    if tile_rows is None:
        tb = _default_tile_rows(B, C, inputs.dtype.itemsize,
                                targets.dtype.itemsize, vmem_cap)
    else:
        tb = int(tile_rows)
    if tb >= B:
        tb = B                                   # single full-extent block
    else:
        tb = max(8, (tb // 8) * 8)               # keep sublane-aligned block rows
    grid = pl.cdiv(B, tb)
    needs_mask = (B % tb) != 0

    args = [inputs, targets]
    in_specs = [
        pl.BlockSpec((tb, C), lambda i: (i, 0)),
        pl.BlockSpec((tb, C), lambda i: (i, 0)),
    ]
    if use_pos_ratio:
        r = jnp.asarray(pos_ratio, jnp.float32).reshape(1, C)
        if hard_targets:
            ratio_data = jnp.concatenate([jnp.exp(r), jnp.exp(1.0 - r)], axis=0)  # (2, C)
        else:
            ratio_data = r                                                         # (1, C)
        args.append(ratio_data)
        in_specs.append(pl.BlockSpec(ratio_data.shape, lambda i: (0, 0)))

    kernel = functools.partial(
        _focal_loss_kernel,
        alpha=float(alpha),
        gamma_int=gamma_int,
        gamma_f=gamma_f,
        rows_total=int(B),
        tile_rows=int(tb),
        use_pos_ratio=use_pos_ratio,
        hard_targets=bool(hard_targets),
        needs_mask=bool(needs_mask),
    )

    compiler_kwargs = dict(dimension_semantics=("parallel",))
    if vmem_cap is not None:
        compiler_kwargs["vmem_limit_bytes"] = int(
            min(vmem_cap * 3 // 4, 96 * 1024 * 1024))

    partials = pl.pallas_call(
        kernel,
        out_shape=jax.ShapeDtypeStruct((grid, 8, C), jnp.float32),
        grid_spec=pltpu.PrefetchScalarGridSpec(
            num_scalar_prefetch=0,
            grid=(grid,),
            in_specs=in_specs,
            out_specs=pl.BlockSpec((1, 8, C), lambda i: (i, 0, 0)),
        ),
        compiler_params=pltpu.CompilerParams(**compiler_kwargs),
    )(*args)

    total = jnp.sum(partials)
    return total / jnp.float32(B) if reduction == "mean" else total


def _reference(inputs, targets, pos_ratio, alpha, gamma, reduction):
    x = inputs.astype(jnp.float32)
    t = targets.astype(jnp.float32)
    bce = jnp.maximum(x, 0.0) - x * t + jnp.log1p(jnp.exp(-jnp.abs(x)))
    pt = jnp.exp(-bce)
    loss = alpha * (1.0 - pt) ** gamma * bce
    if pos_ratio is not None:
        r = pos_ratio.reshape(1, -1).astype(jnp.float32)
        loss = loss * jnp.exp(t * (1.0 - r) + (1.0 - t) * r)
    s = jnp.sum(loss)
    return s / inputs.shape[0] if reduction == "mean" else s


if __name__ == "__main__":
    key = jax.random.PRNGKey(0)
    k1, k2, k3 = jax.random.split(key, 3)

    B, C = 40, 128  # batch x num_attributes (lane-aligned C; B not a tile multiple)
    logits = jax.random.normal(k1, (B, C), dtype=jnp.float32) * 2.0
    targets = (jax.random.uniform(k2, (B, C)) > 0.5).astype(jnp.float32)
    pos_ratio = jax.random.uniform(k3, (C,), minval=0.05, maxval=0.95)

    # 1) multi-block path (grid=3, remainder block masked), hoisted-exp weight
    out = focal_loss(logits, targets, pos_ratio=pos_ratio, alpha=1.0, gamma=2,
                     reduction="mean", hard_targets=True, tile_rows=16)
    out = jax.block_until_ready(out)
    ref = _reference(logits, targets, pos_ratio, 1.0, 2, "mean")
    assert jnp.allclose(out, ref, rtol=1e-5, atol=1e-5), (out, ref)

    # 2) exact (soft-target-safe) weight path, non-unit alpha
    out_soft = jax.block_until_ready(
        focal_loss(logits, targets, pos_ratio=pos_ratio, alpha=0.5, gamma=2,
                   reduction="mean", hard_targets=False, tile_rows=16))
    ref_soft = _reference(logits, targets, pos_ratio, 0.5, 2, "mean")
    assert jnp.allclose(out_soft, ref_soft, rtol=1e-5, atol=1e-5), (out_soft, ref_soft)

    # 3) pos_ratio=None (ratio input dropped from the call), sum reduction, auto tile
    out_sum = jax.block_until_ready(
        focal_loss(logits, targets, pos_ratio=None, alpha=1.0, gamma=2,
                   reduction="sum"))
    ref_sum = _reference(logits, targets, None, 1.0, 2, "sum")
    assert jnp.allclose(out_sum, ref_sum, rtol=1e-5, atol=1e-5), (out_sum, ref_sum)

    # 4) bf16 inputs/targets (halved HBM traffic; kernel upcasts internally)
    logits_bf16 = logits.astype(jnp.bfloat16)
    out_bf16 = jax.block_until_ready(
        focal_loss(logits_bf16, targets.astype(jnp.bfloat16),
                   pos_ratio=pos_ratio, alpha=1.0, gamma=2, reduction="mean",
                   hard_targets=True, tile_rows=16))
    ref_bf16 = _reference(logits_bf16.astype(jnp.float32), targets, pos_ratio,
                          1.0, 2, "mean")
    assert jnp.allclose(out_bf16, ref_bf16, rtol=1e-5, atol=1e-5), (out_bf16, ref_bf16)

    print("KERNEL_OK")
</pallas_src>

<mosaic_0001>
module attributes {stable_mosaic.version = 11 : i64} {
  func.func @_focal_loss_kernel(%arg0: i32, %arg1: memref<16x128xf32, #tpu.memory_space<vmem>>, %arg2: memref<16x128xf32, #tpu.memory_space<vmem>>, %arg3: memref<2x128xf32, #tpu.memory_space<vmem>>, %arg4: memref<1x8x128xf32, #tpu.memory_space<vmem>>) attributes {dimension_semantics = [#tpu.dimension_semantics<parallel>], iteration_bounds = array<i64: 3>, scalar_prefetch = 0 : i64, scratch_operands = 0 : i64, tpu.core_type = #tpu.core_type<tc>, window_params = [{transform_indices = @transform_0, window_bounds = array<i64: 16, 128>}, {transform_indices = @transform_1, window_bounds = array<i64: 16, 128>}, {pipeline_mode = #tpu.pipeline_mode<synchronous>, transform_indices = @transform_2, window_bounds = array<i64: 2, 128>}, {transform_indices = @transform_3, window_bounds = array<i64: 1, 8, 128>}]} {
    %c0 = arith.constant 0 : index
    %c0_0 = arith.constant 0 : index
    %0 = vector.load %arg1[%c0, %c0_0] : memref<16x128xf32, #tpu.memory_space<vmem>>, vector<16x128xf32>
    %c0_1 = arith.constant 0 : index
    %c0_2 = arith.constant 0 : index
    %1 = vector.load %arg2[%c0_1, %c0_2] : memref<16x128xf32, #tpu.memory_space<vmem>>, vector<16x128xf32>
    %cst = arith.constant 0.000000e+00 : f32
    %2 = vector.broadcast %cst : f32 to vector<16x128xf32>
    %3 = arith.maximumf %0, %2 : vector<16x128xf32>
    %4 = arith.mulf %0, %1 : vector<16x128xf32>
    %5 = arith.subf %3, %4 : vector<16x128xf32>
    %6 = math.absf %0 : vector<16x128xf32>
    %cst_3 = arith.constant 0.000000e+00 : f32
    %7 = vector.broadcast %cst_3 : f32 to vector<16x128xf32>
    %8 = arith.subf %7, %6 : vector<16x128xf32>
    %9 = math.exp %8 : vector<16x128xf32>
    %10 = math.log1p %9 : vector<16x128xf32>
    %11 = arith.addf %5, %10 : vector<16x128xf32>
    %cst_4 = arith.constant 0.000000e+00 : f32
    %12 = vector.broadcast %cst_4 : f32 to vector<16x128xf32>
    %13 = arith.subf %12, %11 : vector<16x128xf32>
    %14 = math.exp %13 : vector<16x128xf32>
    %cst_5 = arith.constant 1.000000e+00 : f32
    %15 = vector.broadcast %cst_5 : f32 to vector<16x128xf32>
    %16 = arith.subf %15, %14 : vector<16x128xf32>
    %17 = arith.mulf %16, %16 : vector<16x128xf32>
    %18 = arith.mulf %17, %11 : vector<16x128xf32>
    %c0_6 = arith.constant 0 : index
    %c0_7 = arith.constant 0 : index
    %19 = vector.load %arg3[%c0_6, %c0_7] : memref<2x128xf32, #tpu.memory_space<vmem>>, vector<1x128xf32>
    %c1 = arith.constant 1 : index
    %c0_8 = arith.constant 0 : index
    %20 = vector.load %arg3[%c1, %c0_8] : memref<2x128xf32, #tpu.memory_space<vmem>>, vector<1x128xf32>
    %21 = vector.broadcast %20 : vector<1x128xf32> to vector<16x128xf32>
    %22 = arith.mulf %1, %21 : vector<16x128xf32>
    %cst_9 = arith.constant 1.000000e+00 : f32
    %23 = vector.broadcast %cst_9 : f32 to vector<16x128xf32>
    %24 = arith.subf %23, %1 : vector<16x128xf32>
    %25 = vector.broadcast %19 : vector<1x128xf32> to vector<16x128xf32>
    %26 = arith.mulf %24, %25 : vector<16x128xf32>
    %27 = arith.addf %22, %26 : vector<16x128xf32>
    %28 = arith.mulf %18, %27 : vector<16x128xf32>
    %29 = tpu.iota {dimensions = array<i32: 0>} : vector<16x128xi32>
    %c16_i32 = arith.constant 16 : i32
    %30 = arith.muli %arg0, %c16_i32 : i32
    %31 = vector.broadcast %30 : i32 to vector<16x128xi32>
    %32 = arith.addi %31, %29 : vector<16x128xi32>
    %c40_i32 = arith.constant 40 : i32
    %33 = vector.broadcast %c40_i32 : i32 to vector<16x128xi32>
    %34 = arith.cmpi slt, %32, %33 : vector<16x128xi32>
    %cst_10 = arith.constant 0.000000e+00 : f32
    %35 = vector.broadcast %cst_10 : f32 to vector<16x128xf32>
    %36 = arith.select %34, %28, %35 : vector<16x128xi1>, vector<16x128xf32>
    %cst_11 = arith.constant dense<0.000000e+00> : vector<128xf32>
    %37 = vector.multi_reduction <add>, %36, %cst_11 [0] : vector<16x128xf32> to vector<128xf32>
    %38 = vector.shape_cast %37 : vector<128xf32> to vector<1x128xf32>
    %39 = tpu.iota {dimensions = array<i32: 0>} : vector<8x128xi32>
    %c0_i32 = arith.constant 0 : i32
    %40 = vector.broadcast %c0_i32 : i32 to vector<8x128xi32>
    %41 = arith.cmpi eq, %39, %40 : vector<8x128xi32>
    %cst_12 = arith.constant 0.000000e+00 : f32
    %42 = vector.shape_cast %38 : vector<1x128xf32> to vector<1x128xf32>
    %43 = vector.broadcast %42 : vector<1x128xf32> to vector<8x128xf32>
    %44 = vector.broadcast %cst_12 : f32 to vector<8x128xf32>
    %45 = arith.select %41, %43, %44 : vector<8x128xi1>, vector<8x128xf32>
    %46 = vector.shape_cast %45 : vector<8x128xf32> to vector<1x8x128xf32>
    %c0_13 = arith.constant 0 : index
    %c0_14 = arith.constant 0 : index
    %c0_15 = arith.constant 0 : index
    %47 = vector.load %arg4[%c0_13, %c0_14, %c0_15] : memref<1x8x128xf32, #tpu.memory_space<vmem>>, vector<1x8x128xf32>
    tpu.vector_store %arg4[%c0_13, %c0_14, %c0_15], %46 {strides = array<i32>} : memref<1x8x128xf32, #tpu.memory_space<vmem>>, vector<1x8x128xf32>,
    return
  }
  func.func @transform_0(%arg0: i32) -> (i32, i32) {
    %c0_i32 = arith.constant 0 : i32
    %c0_i32_0 = arith.constant 0 : i32
    return %arg0, %c0_i32 : i32, i32
  }
  func.func @transform_1(%arg0: i32) -> (i32, i32) {
    %c0_i32 = arith.constant 0 : i32
    %c0_i32_0 = arith.constant 0 : i32
    return %arg0, %c0_i32 : i32, i32
  }
  func.func @transform_2(%arg0: i32) -> (i32, i32) {
    %c0_i32 = arith.constant 0 : i32
    %c0_i32_0 = arith.constant 0 : i32
    %c0_i32_1 = arith.constant 0 : i32
    return %c0_i32, %c0_i32_0 : i32, i32
  }
  func.func @transform_3(%arg0: i32) -> (i32, i32, i32) {
    %c0_i32 = arith.constant 0 : i32
    %c0_i32_0 = arith.constant 0 : i32
    %c0_i32_1 = arith.constant 0 : i32
    return %arg0, %c0_i32, %c0_i32_0 : i32, i32, i32
  }
}

</mosaic_0001>

<bundles_post_ra>
// kernel: tpu_custom_call.1
= control target key start
LH: loop header
LB: loop body
LE: loop exit
PB: predicated region body
PF: predicated region fallthrough
CT: control target
= control target key end

     0   :  { %8 = vsyncpa [#allocation3], 0  ;;  %s1006_s0 = inlined_call_operand.hbm [shape: f32[40,128], index: 0, kind: input, shape index: {}]   ;;  %s1007_s1 = inlined_call_operand.hbm [shape: f32[40,128], index: 1, kind: input, shape index: {}]   ;;  %s1008_s2 = inlined_call_operand.hbm [shape: f32[2,128], index: 2, kind: input, shape index: {}]   ;;  %s1009_s3 = inlined_call_operand.hbm [shape: f32[3,8,128], index: 3, kind: output, shape index: {}]  }
   0x1   :  { %10 = vsyncpa [#allocation3 + $0x1], 0 }
   0x2   :  { %11 = vsyncpa [#allocation6], 0 }
   0x3   :  { %13 = vsyncpa [#allocation6 + $0x1], 0 }
   0x4   :  { %14 = vsyncpa [#allocation4], 0 }
   0x5   :  { %16 = vsyncpa [#allocation4 + $0x1], 0  ;;  %s785_s12 = smov 0   ;;  %s787_s13 = smov 0  }
   0x6   :  { %s789_s14 = smov 0   ;;  %s791_s15 = smov 0  }
   0x7 LB: > { %s806_s16 = sadd.s32 4294967295, %s756_s15   ;;  %s474_s17 = sadd.s32 4294967294, %s756_s15   ;;  %s756_s15 = sphi %s791_s15, %s1028_s15   ;;  %s752_s14 = sphi %s789_s14, %s1027_s14   ;;  %s748_s13 = sphi %s787_s13, %s1026_s13   ;;  %s744_s12 = sphi %s785_s12, %s1025_s12  }
   0x8   : > { %s810_s18 = sadd.s32 1, %s756_s15   ;;  %s29_s19 = sadd.s32 1, %s752_s14 }
   0x9   : > { %s26_s20 = ssub.s32 %s756_s15, %s810_s18  ;;  %p36_p0 = scmp.ne.s32.totalorder %s752_s14, %s748_s13 }
   0xa   : > { %p27_p1 = scmp.eq.s32.totalorder %s26_s20, 0  ;;  %p37_p2 = scmp.eq.s32.totalorder %s756_s15, 0 }
   0xb   : > { %p42_p3 = scmp.ne.s32.totalorder %s748_s13, %s744_s12  ;;  %p1011_p4 = scmp.eq.s32.totalorder %s806_s16, 0 }
   0xc   : > { %s822_s21 = scalar_select %p27_p1, %s752_s14, %s29_s19  }
   0xd   : > { %p824_p5 = por %p37_p2, %p36_p0  ;;  %p830_p6 = por %p1011_p4, %p42_p3 }
   0xe   : > { %p113_p7 = scmp.eq.s32.totalorder %s806_s16, 2  ;;  %p119_p8 = scmp.eq.s32.totalorder %s474_s17, 2 }
   0xf   : > { %p475_p9 = scmp.ge.s32.totalorder %s756_s15, 1  ;;  %p126_p10 = scmp.lt.s32.totalorder %s756_s15, 4 }
  0x10   : > { %p837_p11 = por %p113_p7, %p36_p0  ;;  %p841_p12 = por %p119_p8, %p42_p3 }
  0x11   : > { %p845_p13 = pnand %p475_p9, %p126_p10  ;;  %s138_s29 = sshll.u32 %s1008_s2, 4  ;;  %s139_s29 = int_to_ptr.hbm [resolvable:$true] %s138_s29 }
  0x12   : > { %s1015_s24 = scalar_select %p837_p11, 1, 0 }
  0x13   : > { %s1016_s25 = scalar_select %p841_p12, 1, 0 }
  0x14   : > { %p512_p1 = pneg %p845_p13  ;;  %s758_s30 = smov [#allocation7]  }
  0x15   : > { %s140_s4 = sshll.u32 %s758_s30, 4  ;;  %p477_p2 = scmp.ge.s32.totalorder %s756_s15, 3  ;;  %s141_s4 = int_to_ptr.vmem [resolvable:$true] %s140_s4 }
  0x16   : > { %p513_p0 = pnand %p512_p1, %p1011_p4 }
  0x17   : > { %147 = sbr.rel (%p477_p2) target bundleno = 101 (0x65), region = 20 }
  0x18   : > { %515 = dma.hbm_to_vmem [thread:$0]  (!%p513_p0), %s139_s29, 32, %s141_s4, [#allocation6]  }
  0x1c   : > { %150 = sbr.rel (!%p824_p5) target bundleno = 65 (0x41), region = 24  ;;  %s151_s5 = sand.u32 (%p824_p5), 1, %s752_s14  }
  0x1d   : > { %s479_s6 = sshll.u32 (%p824_p5), %s756_s15, 1  ;;  %s478_s7 = sshll.u32 (%p824_p5), %s151_s5, 4 }
  0x1e   : > { %s157_s8 = ssub.s32 (%p824_p5), 5, %s479_s6  ;;  %s864_s17 = scalar_lea.sflag (%p824_p5), [#allocation3], %s151_s5 }
  0x1f   : > { %p158_p3 = scmp.lt.s32.totalorder (%p824_p5), %s157_s8, 2  ;;  %s155_s19 = scalar_lea.vmem (%p824_p5), [#allocation2], %s478_s7 }
  0x21   : > { %s1030_s8 = smov (!%p158_p3, %s157_s8), 2 }
  0x22   : > { %s480_s9 = sshll.u32 %s1030_s8, 3 }
  0x23   : > { %s161_s10 = ssub.s32 16, %s480_s9 }
  0x24   : > { %s162_s11 = sshll.u32 %s161_s10, 4 }
  0x25   : > { %163 = vsyncadd %s864_s17, %s162_s11  ;;  %p867_p7 = scmp.ne.s32.totalorder %s480_s9, 0  ;;  %s502_s27 = sshll.u32 %s756_s15, 4 }
  0x26   : > { %s166_s30 = scalar_lea.hbm %s1006_s0, %s502_s27  ;;  %s875_s4 = sshll.u32 %s155_s19, 4  ;;  %s171_s4 = int_to_ptr.vmem [resolvable:$true] %s875_s4 }
  0x27   : > { %s168_s5 = sshll.u32 %s166_s30, 4  ;;  %s1010_s6 = sshll.u32 %s1030_s8, 7  ;;  %s878_s5 = int_to_ptr.hbm [resolvable:$true] %s168_s5 }
  0x28   : > { %s604_s7 = sshra.s32 %s878_s5, 4  ;;  %s606_s9 = sshrl.u32 %s1010_s6, 4  ;;  %s605_s7 = int_to_ptr.hbm [resolvable:$true] %s604_s7 }
  0x29   : > { %s611_s10 = scalar_lea.hbm %s605_s7, %s606_s9  ;;  %s615_s19 = scalar_lea.hbm %s1006_s0, 40 }
  0x2a   : > { %p612_p8 = scmp.ne.s32.totalorder %s605_s7, %s611_s10  ;;  %p616_p1 = scmp.lt.s32.totalorder %s605_s7, %s1006_s0 }
  0x2b   : > { %p617_p0 = scmp.lt.s32.totalorder %s615_s19, %s611_s10 }
  0x2c   : > { %p613_p9 = pnand %p612_p8, %p867_p7 }
  0x2d   : > { %p618_p2 = por %p617_p0, %p616_p1 }
  0x2e   : > { %p614_p10 = pneg %p613_p9 }
  0x30   : > { %p619_p3 = pnand %p618_p2, %p614_p10 }
  0x32   : > { %622 = shalt.err (!%p619_p3)
}
  0x33   : > { %s623_s30 = sshra.s32 %s171_s4, 4  ;;  %s759_s11 = smov [#allocation2]   ;;  %s624_s30 = int_to_ptr.vmem [resolvable:$true] %s623_s30 }
  0x34   : > { %s630_s6 = scalar_lea.vmem %s624_s30, %s606_s9  ;;  %s634_s27 = scalar_lea.vmem %s759_s11, 32 }
  0x35   : > { %p631_p8 = scmp.ne.s32.totalorder %s624_s30, %s630_s6  ;;  %p636_p12 = scmp.lt.s32.totalorder %s634_s27, %s630_s6 }
  0x37   : > { %p632_p9 = pnand %p631_p8, %p867_p7 }
  0x39   : > { %p633_p4 = pneg %p632_p9 }
  0x3b   : > { %p638_p11 = pnand %p636_p12, %p633_p4 }
  0x3d   : > { %641 = shalt.err (!%p638_p11)
}
  0x3e   : > { %s760_s7 = smov 128   ;;  %s761_s10 = smov 8  }
  0x3f   : > { %s1019_s19 = sshll.u32 %s1030_s8, 7 }
  0x40   : > { %176 = dma.hbm_to_vmem [thread:$0]  (%p867_p7), %s878_s5, %s1019_s19, %s171_s4, %s864_s17, %s760_s7, %s760_s7, %s761_s10  }
  0x41 PF: > { %179 = sbr.rel (!%p824_p5) target bundleno = 101 (0x65), region = 28  ;;  %s180_s6 = sand.u32 (%p824_p5), 1, %s756_s15  }
  0x42   : > { %s182_s9 = sand.u32 (%p824_p5), 1, %s752_s14   ;;  %s486_s29 = sshll.u32 (%p824_p5), %s756_s15, 1 }
  0x43   : > { %s485_s28 = sshll.u32 (%p824_p5), %s182_s9, 4  ;;  %s186_s30 = ssub.s32 (%p824_p5), 5, %s486_s29 }
  0x44   : > { %p187_p4 = scmp.lt.s32.totalorder (%p824_p5), %s186_s30, 2  ;;  %s912_s17 = scalar_lea.sflag (%p824_p5), [#allocation6], %s180_s6 }
  0x45   : > { %s184_s22 = scalar_lea.vmem (%p824_p5), [#allocation5], %s485_s28 }
  0x46   : > { %s1032_s30 = smov (!%p187_p4, %s186_s30), 2 }
  0x47   : > { %s487_s20 = sshll.u32 %s1032_s30, 3 }
  0x48   : > { %s190_s11 = ssub.s32 16, %s487_s20 }
  0x49   : > { %s191_s8 = sshll.u32 %s190_s11, 4 }
  0x4a   : > { %192 = vsyncadd %s912_s17, %s191_s8  ;;  %p915_p5 = scmp.ne.s32.totalorder %s487_s20, 0  ;;  %s503_s5 = sshll.u32 %s756_s15, 4 }
  0x4b   : > { %s195_s10 = scalar_lea.hbm %s1007_s1, %s503_s5  ;;  %s923_s19 = sshll.u32 %s184_s22, 4  ;;  %s200_s19 = int_to_ptr.vmem [resolvable:$true] %s923_s19 }
  0x4c   : > { %s197_s6 = sshll.u32 %s195_s10, 4  ;;  %s491_s9 = sshll.u32 %s1032_s30, 7  ;;  %s926_s6 = int_to_ptr.hbm [resolvable:$true] %s197_s6 }
  0x4d   : > { %s643_s28 = sshra.s32 %s926_s6, 4  ;;  %s645_s29 = sshrl.u32 %s491_s9, 4  ;;  %s644_s28 = int_to_ptr.hbm [resolvable:$true] %s643_s28 }
  0x4e   : > { %s650_s20 = scalar_lea.hbm %s644_s28, %s645_s29  ;;  %s654_s22 = scalar_lea.hbm %s1007_s1, 40 }
  0x4f   : > { %p651_p11 = scmp.ne.s32.totalorder %s644_s28, %s650_s20  ;;  %p655_p10 = scmp.lt.s32.totalorder %s644_s28, %s1007_s1 }
  0x50   : > { %p656_p1 = scmp.lt.s32.totalorder %s654_s22, %s650_s20 }
  0x51   : > { %p652_p12 = pnand %p651_p11, %p915_p5 }
  0x52   : > { %p657_p0 = por %p656_p1, %p655_p10 }
  0x53   : > { %p653_p7 = pneg %p652_p12 }
  0x55   : > { %p658_p2 = pnand %p657_p0, %p653_p7 }
  0x57   : > { %661 = shalt.err (!%p658_p2)
}
  0x58   : > { %s662_s7 = sshra.s32 %s200_s19, 4  ;;  %s762_s11 = smov [#allocation5]   ;;  %s663_s7 = int_to_ptr.vmem [resolvable:$true] %s662_s7 }
  0x59   : > { %s669_s10 = scalar_lea.vmem %s663_s7, %s645_s29  ;;  %s673_s8 = scalar_lea.vmem %s762_s11, 32 }
  0x5a   : > { %p670_p3 = scmp.ne.s32.totalorder %s663_s7, %s669_s10  ;;  %p675_p4 = scmp.lt.s32.totalorder %s673_s8, %s669_s10 }
  0x5c   : > { %p671_p8 = pnand %p670_p3, %p915_p5 }
  0x5e   : > { %p672_p9 = pneg %p671_p8 }
  0x60   : > { %p677_p11 = pnand %p675_p4, %p672_p9 }
  0x62   : > { %680 = shalt.err (!%p677_p11)
}
  0x63   : > { %s763_s28 = smov 128   ;;  %s764_s20 = smov 8  }
  0x64   : > { %205 = dma.hbm_to_vmem [thread:$0]  (%p915_p5), %s926_s6, %s491_s9, %s200_s19, %s912_s17, %s763_s28, %s763_s28, %s764_s20  }
  0x65 PF: > { %211 = sbr.rel (%p845_p13) target bundleno = 180 (0xb4), region = 32  ;;  %s955_s29 = sand.u32 (!%p845_p13), 1, %s748_s13  }
  0x66   : > { %s493_s22 = sshll.u32 (!%p845_p13), %s955_s29, 4  ;;  %s214_s5 = scalar_lea.sflag (!%p845_p13), [#allocation3], %s955_s29 }
  0x67   : > { %s217_s27 = scalar_lea.vmem (!%p845_p13), [#allocation2], %s493_s22 }
  0x6a   : > { %727 = dma.done.wait (%p830_p6), %s214_s5, 256  }
  0x6b   : > { %729 = vsyncadd (%p830_p6), %s214_s5, 4294967040  ;;  %s223_s30 = sand.u32 1, %s806_s16   ;;  %s227_s26 = scalar_lea.vmem [#allocation5], %s493_s22 }
  0x6c   : > { %s224_s17 = scalar_lea.sflag [#allocation6], %s223_s30 }
  0x6d   : > { %731 = dma.done.wait (%p830_p6), %s224_s17, 256  }
  0x6e   : > { %733 = vsyncadd (%p830_p6), %s224_s17, 4294967040  ;;  %p1021_p13 = scmp.eq.s32.totalorder %s806_s16, 0 }
  0x70   : > { %735 = dma.done.wait (%p1021_p13), [#allocation6], 32   ;;  %p1022_p5 = pmov %p1021_p13 }
  0x71   : > { %v271_v0 = vld [vmem:[%s217_s27] sm:$0xff]  ;;  %v272_v1 = vld [vmem:[%s217_s27 + $0x8] sm:$0xff]  ;;  %v335_v38 = vlaneseq  ;;  %s497_s23 = sshll.u32 %s806_s16, 4  ;;  %s496_s4 = sshll.u32 %s955_s29, 3 }
  0x72   : > { %737 = vsyncadd (%p1022_p5), [#allocation6], 4294967264  ;;  %v281_v2 = vand.u32 2147483647, %v271_v0  ;;  %v282_v3 = vand.u32 2147483647, %v272_v1  ;;  %v339_v49 = vstv %s497_s23 }
  0x73   : > { %v273_v12 = vld [vmem:[%s227_s26] sm:$0xff]  ;;  %v274_v15 = vld [vmem:[%s227_s26 + $0x8] sm:$0xff]  ;;  %v275_v17 = vmax.f32 %v271_v0, 0.0  ;;  %v276_v21 = vmax.f32 %v272_v1, 0.0  ;;  %v336_v44 = vshrl.u32 %v335_v38, 7  ;;  %s499_s19 = sshll.u32 %s806_s16, 3 }
  0x74   : > { %v283_v4 = vsub.f32 0.0, %v281_v2  ;;  %v284_v5 = vsub.f32 0.0, %v282_v3  ;;  %v277_v18 = vmul.f32 %v273_v12, %v271_v0  ;;  %v278_v22 = vmul.f32 %v274_v15, %v272_v1  ;;  %v560_v41 = vld [vmem:[#allocation7 + $0x1] ss:$0 sm:$0xff]  ;;  %v561_v43 = vld [vmem:[#allocation7] ss:$0 sm:$0xff]  ;;  %s367_s7 = scalar_lea.hbm %s1009_s3, %s499_s19 }
  0x75   : > { %v326_v42 = vsub.f32 1.0, %v273_v12  ;;  %v327_v45 = vsub.f32 1.0, %v274_v15  ;;  %v324_v46 = vmul.f32 %v560_v41, %v273_v12  ;;  %v337_v48 = vadd.s32 8, %v336_v44  ;;  %s260_s10 = scalar_lea.vmem [#allocation8], %s496_s4  ;;  %s371_s8 = sshll.u32 %s367_s7, 4  ;;  %s372_s8 = int_to_ptr.hbm [resolvable:$true] %s371_s8 }
  0x76   : > { %v285_v6 = vmul.f32 1.442695, %v283_v4  ;;  %v287_v7 = vmul.f32 1.442695, %v284_v5  ;;  %v279_v26 = vsub.f32 %v275_v17, %v277_v18  ;;  %v280_v29 = vsub.f32 %v276_v21, %v278_v22  ;;  %s369_s11 = sshll.u32 %s260_s10, 4  ;;  %s357_s28 = scalar_lea.sflag [#allocation4], %s955_s29  ;;  %s370_s11 = int_to_ptr.vmem [resolvable:$true] %s369_s11 }
  0x77   : > { %v329_v47 = vmul.f32 %v561_v43, %v326_v42  ;;  %v325_v51 = vmul.f32 %v560_v41, %v274_v15  ;;  %v330_v52 = vmul.f32 %v561_v43, %v327_v45  ;;  %v340_v56 = vadd.s32 %v339_v49, %v336_v44  ;;  %s696_s20 = sshra.s32 %s372_s8, 4  ;;  %p1023_p12 = scmp.ne.s32.totalorder %s1015_s24, 0  ;;  %s697_s20 = int_to_ptr.hbm [resolvable:$true] %s696_s20 }
  0x78   : > { %562 = vpow2.f32 %v285_v6  ;;  %v341_v59 = vadd.s32 %v339_v49, %v337_v48  ;;  %vm353_vm4 = vcmp.eq.s32.totalorder %v336_v44, 0  ;;  %s698_s16 = scalar_lea.hbm %s697_s20, 8  ;;  %s702_s27 = scalar_lea.hbm %s1009_s3, 24 }
  0x79   : > { %564 = vpow2.f32 %v287_v7  ;;  %v331_v58 = vadd.f32 %v329_v47, %v324_v46  ;;  %v332_v61 = vadd.f32 %v330_v52, %v325_v51  ;;  %vm342_vm2 = vcmp.lt.s32.totalorder %v340_v56, 40  ;;  %p699_p6 = scmp.ne.s32.totalorder %s697_s20, %s698_s16  ;;  %p703_p1 = scmp.lt.s32.totalorder %s697_s20, %s1009_s3 }
  0x7a   : > { %vm343_vm3 = vcmp.lt.s32.totalorder %v341_v59, 40  ;;  %p704_p0 = scmp.lt.s32.totalorder %s702_s27, %s698_s16 }
  0x7b   : > { %p700_p7 = pnand %p699_p6, %p1023_p12 }
  0x7c   : > { %p705_p2 = por %p704_p0, %p703_p1 }
  0x7d   : > { %p701_p10 = pneg %p700_p7 }
  0x7e   : > { %v563_v8 = vpop.eup %562 }
  0x7f   : > { %v565_v9 = vpop.eup %564  ;;  %v289_v10 = vadd.f32 1.0, %v563_v8  ;;  %v292_v11 = vmul.f32 -0.5, %v563_v8  ;;  %v295_v19 = vand.u32 2147483647, %v563_v8  ;;  %p706_p3 = pnand %p705_p2, %p701_p10 }
  0x80   : > { %v298_v13 = vadd.f32 1.0, %v565_v9  ;;  %v301_v14 = vmul.f32 -0.5, %v565_v9  ;;  %v304_v23 = vand.u32 2147483647, %v565_v9 }
  0x81   : > { %566 = vlog2.f32 %v289_v10  ;;  %v293_v16 = vadd.f32 1.0, %v292_v11  ;;  %vm296_vm0 = vcmp.lt.f32.partialorder %v295_v19, 0.0004427343 }
  0x82   : > { %568 = vlog2.f32 %v298_v13  ;;  %v302_v20 = vadd.f32 1.0, %v301_v14  ;;  %vm305_vm1 = vcmp.lt.f32.partialorder %v304_v23, 0.0004427343 }
  0x83   : > { %v294_v24 = vmul.f32 %v563_v8, %v293_v16 }
  0x84   : > { %v303_v27 = vmul.f32 %v565_v9, %v302_v20 }
  0x87   : > { %v567_v25 = vpop.eup %566 }
  0x88   : > { %v569_v28 = vpop.eup %568  ;;  %v291_v30 = vmul.f32 0.6931472, %v567_v25 }
  0x89   : > { %v300_v31 = vmul.f32 0.6931472, %v569_v28 }
  0x8a   : > { %v297_v32 = vsel %vm296_vm0, %v294_v24, %v291_v30 }
  0x8b   : > { %v306_v33 = vsel %vm305_vm1, %v303_v27, %v300_v31  ;;  %v307_v34 = vadd.f32 %v297_v32, %v279_v26 }
  0x8c   : > { %v308_v35 = vadd.f32 %v306_v33, %v280_v29 }
  0x8d   : > { %v309_v36 = vsub.f32 0.0, %v307_v34 }
  0x8e   : > { %v310_v37 = vsub.f32 0.0, %v308_v35 }
  0x8f   : > { %v311_v39 = vmul.f32 1.442695, %v309_v36 }
  0x90   : > { %v313_v40 = vmul.f32 1.442695, %v310_v37 }
  0x91   : > { %570 = vpow2.f32 %v311_v39 }
  0x92   : > { %572 = vpow2.f32 %v313_v40 }
  0x97   : > { %v571_v50 = vpop.eup %570 }
  0x98   : > { %v573_v53 = vpop.eup %572  ;;  %v315_v54 = vsub.f32 1.0, %v571_v50 }
  0x99   : > { %v316_v55 = vsub.f32 1.0, %v573_v53 }
  0x9a   : > { %v317_v57 = vmul.f32 %v315_v54, %v315_v54 }
  0x9b   : > { %v318_v60 = vmul.f32 %v316_v55, %v316_v55 }
  0x9c   : > { %v319_v62 = vmul.f32 %v317_v57, %v307_v34 }
  0x9d   : > { %v320_v63 = vmul.f32 %v318_v60, %v308_v35 }
  0x9e   : > { %v333_v0 = vmul.f32 %v331_v58, %v319_v62 }
  0x9f   : > { %v334_v1 = vmul.f32 %v332_v61, %v320_v63 }
  0xa0   : > { %v344_v2 = vsel %vm342_vm2, %v333_v0, 0.0 }
  0xa1   : > { %v345_v3 = vsel %vm343_vm3, %v334_v1, 0.0 }
  0xa2   : > { %v346_v4 = vadd.f32 %v345_v3, %v344_v2 }
  0xa4   : > { %v347_v5 = vrot.slane %v346_v4, 4 }
  0xa6   : > { %v348_v6 = vadd.f32 %v347_v5, %v346_v4 }
  0xa8   : > { %v349_v7 = vrot.slane %v348_v6, 2 }
  0xaa   : > { %v350_v8 = vadd.f32 %v349_v7, %v348_v6 }
  0xac   : > { %v351_v9 = vrot.slane %v350_v8, 1 }
  0xae   : > { %v352_v10 = vadd.f32 %v351_v9, %v350_v8 }
  0xb0   : > { %v354_v11 = vsel %vm353_vm4, %v352_v10, 0.0 }
  0xb1   : > { %355 = vst [vmem:[%s260_s10] sm:$0xff] %v354_v11 }
  0xb2   : > { %709 = shalt.err (!%p706_p3)
}
  0xb3   : > { %510 = dma.vmem_to_hbm [thread:$0]  (%p1023_p12), %s370_s11, 128, %s372_s8, %s357_s28  }
  0xb4 PF: > { %p522_p8 = scmp.ge.s32.totalorder %s756_s15, 2  ;;  %s383_s29 = sand.u32 1, %s744_s12  }
  0xb5   : > { %p1024_p9 = scmp.ne.s32.totalorder %s1016_s25, 0  ;;  %s384_s26 = scalar_lea.sflag [#allocation4], %s383_s29 }
  0xb7   : > { %p517_p4 = pnand %p522_p8, %p1024_p9 }
  0xb9   : > { %p518_p11 = pneg %p517_p4 }
  0xbb   : > { %739 = dma.done.wait (%p518_p11), %s384_s26, 128  }
  0xbc   : > { %741 = vsyncadd (%p518_p11), %s384_s26, 4294967168  ;;  %p19_p13 = scmp.ge.s32.totalorder %s810_s18, 5   ;;  %s1025_s12 = smov %s748_s13 }
  0xbd   : > { %s1026_s13 = smov %s752_s14  ;;  %s1027_s14 = smov %s822_s21 }
  0xbe   : > { %s1028_s15 = smov %s810_s18  ;;  %21 = sbr.rel (!%p19_p13) target bundleno = 7 (0x7), region = 94 }
  0xc3   :  { %390 = vsyncpa [#allocation3], 1 }
  0xc4   :  { %392 = vsyncpa [#allocation3 + $0x1], 1 }
  0xc5   :  { %393 = vsyncpa [#allocation6], 1 }
  0xc6   :  { %395 = vsyncpa [#allocation6 + $0x1], 1 }
  0xc7   :  { %396 = vsyncpa [#allocation4], 1 }
  0xc8   :  { %398 = vsyncpa [#allocation4 + $0x1], 1 }

</bundles_post_ra>
